<compile_context>
chip_gen: v7x
topology: tpu7x:2x2x1
jax: 0.10.0
libtpu: 0.0.40
codegen_flags: <defaults>
</compile_context>

<pallas_src>
import functools

import jax
import jax.numpy as jnp
from jax.experimental import pallas as pl
from jax.experimental.pallas import tpu as pltpu

_LANE = 128


def _cdiv(a: int, b: int) -> int:
    return -(-a // b)


def _round_up(x: int, m: int) -> int:
    return _cdiv(x, m) * m


def _binary_classifier_kernel(x1_ref, x2_ref, w_ref, b_ref, o_ref, *, precision):
    # x1_ref/x2_ref: (TB, D) streamed activations
    # w_ref:         (2, 2, D) packed weights [W[:, :D], W[:, D:]], lane-dense
    # b_ref:         (2, 1) f32 bias
    # o_ref:         (2, TB) transposed output block (lane-dense stores)
    dims = (((1,), (1,)), ((), ()))  # contract last dims: (2, D) x (TB, D) -> (2, TB)
    acc = jax.lax.dot_general(w_ref[0], x1_ref[...], dims,
                              preferred_element_type=jnp.float32,
                              precision=precision)
    acc = acc + jax.lax.dot_general(w_ref[1], x2_ref[...], dims,
                                    preferred_element_type=jnp.float32,
                                    precision=precision)
    acc = acc + b_ref[...]  # (2, 1) broadcasts over the TB lanes
    o_ref[...] = acc.astype(o_ref.dtype)


@functools.partial(
    jax.jit, static_argnames=("block_rows", "target_tile_bytes", "precision"))
def binary_classifier_forward(x1, x2, weight, bias, *,
                              block_rows: int | None = None,
                              target_tile_bytes: int = 8 * 1024 * 1024,
                              precision=None):
    """Equivalent of BinaryClassifier.forward.

    x1, x2: (B, D) activations (f32 or bf16 -- the kernel reads them as-is; pass
            bf16 from the producer to halve HBM traffic, accumulation stays f32).
    weight: (2, 2*D) torch nn.Linear layout.   bias: (2,).
    Returns (B, 2) float32.

    block_rows:        optional explicit batch-tile rows (rounded up to 128).
    target_tile_bytes: per-input-stream tile byte budget used to derive the
                       batch tile when block_rows is None (default 8 MiB; total
                       pipelined footprint ~4x that, sized for v7x's 64 MiB VMEM).
    precision:         forwarded to the in-kernel dots. Default (single-pass MXU)
                       keeps the kernel HBM-bound on all generations; use
                       jax.lax.Precision.HIGHEST only when bit-faithful f32 vs.
                       the PyTorch reference is required.
    """
    B, D = x1.shape
    assert x2.shape == (B, D)
    assert x1.dtype == x2.dtype, "x1/x2 must share a dtype"
    assert weight.shape == (2, 2 * D)
    assert bias.shape == (2,)

    compute_dtype = x1.dtype
    itemsize = jnp.dtype(compute_dtype).itemsize

    # Pack weights lane-dense: (2, 2, D) = [W[:, :D], W[:, D:]]; tiny, fuses under jit.
    w_packed = jnp.stack([weight[:, :D], weight[:, D:]], axis=0).astype(compute_dtype)
    b2 = bias.reshape(2, 1).astype(jnp.float32)

    # --- batch tile size (byte-budget driven, multiple of 128 lanes) ------------
    bytes_per_row = max(D * itemsize, 1)
    if block_rows is not None:
        tb = max(_LANE, _round_up(int(block_rows), _LANE))
    else:
        budget_rows = max(_LANE, (target_tile_bytes // bytes_per_row) // _LANE * _LANE)
        budget_rows = min(budget_rows, 32768)  # bound the lane extent of the (2, TB) block
        # At least 2 grid steps when B > 128 so both v7x TensorCores get work.
        two_step_rows = max(_LANE, _round_up(_cdiv(B, 2), _LANE))
        tb = min(budget_rows, two_step_rows)

    grid = (_cdiv(B, tb),)

    # Explicit scoped-VMEM limit: 2 input streams x 2 pipeline buffers + output
    # buffers + resident weights/bias + headroom. Stays well under v7x's 64 MiB
    # with the default 8 MiB tile budget.
    tile_bytes = tb * D * itemsize
    out_tile_bytes = 8 * tb * 4            # (2, tb) f32, sublanes padded to 8
    w_bytes = 2 * 8 * D * itemsize         # (2, 2, D), sublanes padded to 8
    vmem_limit = int(max(2 * 2 * tile_bytes + 2 * out_tile_bytes
                         + 2 * (w_bytes + 4096) + (4 << 20),
                         16 << 20))

    kernel = functools.partial(_binary_classifier_kernel, precision=precision)

    out_t = pl.pallas_call(
        kernel,
        out_shape=jax.ShapeDtypeStruct((2, B), jnp.float32),
        grid_spec=pltpu.PrefetchScalarGridSpec(
            num_scalar_prefetch=0,
            grid=grid,
            in_specs=[
                # Streaming batch-tiled activations (double-buffered by Pallas).
                pl.BlockSpec((tb, D), lambda i: (i, 0)),
                pl.BlockSpec((tb, D), lambda i: (i, 0)),
                # Weights / bias: constant block index -> fetched once, resident.
                pl.BlockSpec((2, 2, D), lambda i: (0, 0, 0)),
                pl.BlockSpec((2, 1), lambda i: (0, 0)),
            ],
            out_specs=pl.BlockSpec((2, tb), lambda i: (0, i)),
        ),
        compiler_params=pltpu.CompilerParams(
            # Batch tiles are independent -> shard across both TensorCores on v7x.
            dimension_semantics=("parallel",),
            vmem_limit_bytes=vmem_limit,
        ),
    )(x1, x2, w_packed, b2)

    # Tiny (2, B) -> (B, 2) transpose in the wrapper (fused under jit).
    return out_t.T


if __name__ == "__main__":
    key = jax.random.PRNGKey(0)
    k1, k2, kw, kb = jax.random.split(key, 4)

    B = 384   # small demo batch; auto tiling gives a 2-step grid with a partial tail
    D = 32    # input_dim -> nn.Linear(in_features=2*D=64, out_features=2)

    x1 = jax.random.normal(k1, (B, D), dtype=jnp.float32)
    x2 = jax.random.normal(k2, (B, D), dtype=jnp.float32)
    weight = jax.random.normal(kw, (2, 2 * D), dtype=jnp.float32) * 0.1
    bias = jax.random.normal(kb, (2,), dtype=jnp.float32) * 0.1

    # Pure-JAX reference (f32).
    ref = jnp.concatenate([x1, x2], axis=1) @ weight.T + bias

    # Auto-tiled path, default MXU precision (single-pass): loose tolerance.
    out = jax.block_until_ready(binary_classifier_forward(x1, x2, weight, bias))
    assert out.shape == (B, 2)
    assert jnp.allclose(out, ref, atol=2e-2, rtol=2e-2), "default-precision mismatch"

    # Explicit 128-row tiles (3-step pipelined grid) + HIGHEST precision:
    # bit-close to the f32 PyTorch reference.
    out_hi = jax.block_until_ready(
        binary_classifier_forward(x1, x2, weight, bias, block_rows=128,
                                  precision=jax.lax.Precision.HIGHEST))
    assert jnp.allclose(out_hi, ref, atol=1e-4, rtol=1e-4), "HIGHEST-precision mismatch"

    # Ragged batch: no wrapper-side padding, the last grid step is a partial block.
    out_ragged = jax.block_until_ready(
        binary_classifier_forward(x1[:250], x2[:250], weight, bias, block_rows=128))
    assert out_ragged.shape == (250, 2)
    assert jnp.allclose(out_ragged, ref[:250], atol=2e-2, rtol=2e-2), "ragged mismatch"

    # bf16 activations supplied by the caller (the kernel reads half the HBM
    # bytes; weights follow the activation dtype, accumulation stays f32).
    out_bf16 = jax.block_until_ready(
        binary_classifier_forward(x1.astype(jnp.bfloat16), x2.astype(jnp.bfloat16),
                                  weight, bias))
    assert jnp.allclose(out_bf16, ref, atol=1e-1, rtol=5e-2), "bf16 mismatch"

    print("KERNEL_OK")
</pallas_src>

<mosaic_0001>
module attributes {stable_mosaic.version = 11 : i64} {
  func.func @_binary_classifier_kernel(%arg0: i32, %arg1: memref<256x32xf32, #tpu.memory_space<vmem>>, %arg2: memref<256x32xf32, #tpu.memory_space<vmem>>, %arg3: memref<2x2x32xf32, #tpu.memory_space<vmem>>, %arg4: memref<2x1xf32, #tpu.memory_space<vmem>>, %arg5: memref<2x256xf32, #tpu.memory_space<vmem>>) attributes {dimension_semantics = [#tpu.dimension_semantics<parallel>], iteration_bounds = array<i64: 2>, scalar_prefetch = 0 : i64, scratch_operands = 0 : i64, tpu.core_type = #tpu.core_type<tc>, window_params = [{transform_indices = @transform_0, window_bounds = array<i64: 256, 32>}, {transform_indices = @transform_1, window_bounds = array<i64: 256, 32>}, {pipeline_mode = #tpu.pipeline_mode<synchronous>, transform_indices = @transform_2, window_bounds = array<i64: 2, 2, 32>}, {pipeline_mode = #tpu.pipeline_mode<synchronous>, transform_indices = @transform_3, window_bounds = array<i64: 2, 1>}, {transform_indices = @transform_4, window_bounds = array<i64: 2, 256>}]} {
    %c0 = arith.constant 0 : index
    %c0_0 = arith.constant 0 : index
    %c0_1 = arith.constant 0 : index
    %0 = vector.load %arg3[%c0, %c0_0, %c0_1] : memref<2x2x32xf32, #tpu.memory_space<vmem>>, vector<1x2x32xf32>
    %1 = vector.shape_cast %0 : vector<1x2x32xf32> to vector<2x32xf32>
    %c0_2 = arith.constant 0 : index
    %c0_3 = arith.constant 0 : index
    %2 = vector.load %arg1[%c0_2, %c0_3] : memref<256x32xf32, #tpu.memory_space<vmem>>, vector<256x32xf32>
    %cst = arith.constant dense<0.000000e+00> : vector<2x256xf32>
    %3 = tpu.matmul %1, %2, %cst {dimension_numbers = #tpu.dot_dimension_numbers<[1], [1], [0], [0], [0, 0, 1, 0], [], []>} : vector<2x32xf32>, vector<256x32xf32>, vector<2x256xf32> -> vector<2x256xf32>
    %c1 = arith.constant 1 : index
    %c0_4 = arith.constant 0 : index
    %c0_5 = arith.constant 0 : index
    %4 = vector.load %arg3[%c1, %c0_4, %c0_5] : memref<2x2x32xf32, #tpu.memory_space<vmem>>, vector<1x2x32xf32>
    %5 = vector.shape_cast %4 : vector<1x2x32xf32> to vector<2x32xf32>
    %c0_6 = arith.constant 0 : index
    %c0_7 = arith.constant 0 : index
    %6 = vector.load %arg2[%c0_6, %c0_7] : memref<256x32xf32, #tpu.memory_space<vmem>>, vector<256x32xf32>
    %cst_8 = arith.constant dense<0.000000e+00> : vector<2x256xf32>
    %7 = tpu.matmul %5, %6, %cst_8 {dimension_numbers = #tpu.dot_dimension_numbers<[1], [1], [0], [0], [0, 0, 1, 0], [], []>} : vector<2x32xf32>, vector<256x32xf32>, vector<2x256xf32> -> vector<2x256xf32>
    %8 = arith.addf %3, %7 : vector<2x256xf32>
    %c0_9 = arith.constant 0 : index
    %c0_10 = arith.constant 0 : index
    %9 = vector.load %arg4[%c0_9, %c0_10] : memref<2x1xf32, #tpu.memory_space<vmem>>, vector<2x1xf32>
    %10 = vector.broadcast %9 : vector<2x1xf32> to vector<2x256xf32>
    %11 = arith.addf %8, %10 : vector<2x256xf32>
    %c0_11 = arith.constant 0 : index
    %c0_12 = arith.constant 0 : index
    %12 = vector.load %arg5[%c0_11, %c0_12] : memref<2x256xf32, #tpu.memory_space<vmem>>, vector<2x256xf32>
    tpu.vector_store %arg5[%c0_11, %c0_12], %11 {strides = array<i32>} : memref<2x256xf32, #tpu.memory_space<vmem>>, vector<2x256xf32>,
    return
  }
  func.func @transform_0(%arg0: i32) -> (i32, i32) {
    %c0_i32 = arith.constant 0 : i32
    %c0_i32_0 = arith.constant 0 : i32
    return %arg0, %c0_i32 : i32, i32
  }
  func.func @transform_1(%arg0: i32) -> (i32, i32) {
    %c0_i32 = arith.constant 0 : i32
    %c0_i32_0 = arith.constant 0 : i32
    return %arg0, %c0_i32 : i32, i32
  }
  func.func @transform_2(%arg0: i32) -> (i32, i32, i32) {
    %c0_i32 = arith.constant 0 : i32
    %c0_i32_0 = arith.constant 0 : i32
    %c0_i32_1 = arith.constant 0 : i32
    %c0_i32_2 = arith.constant 0 : i32
    return %c0_i32, %c0_i32_0, %c0_i32_1 : i32, i32, i32
  }
  func.func @transform_3(%arg0: i32) -> (i32, i32) {
    %c0_i32 = arith.constant 0 : i32
    %c0_i32_0 = arith.constant 0 : i32
    %c0_i32_1 = arith.constant 0 : i32
    return %c0_i32, %c0_i32_0 : i32, i32
  }
  func.func @transform_4(%arg0: i32) -> (i32, i32) {
    %c0_i32 = arith.constant 0 : i32
    %c0_i32_0 = arith.constant 0 : i32
    return %c0_i32, %arg0 : i32, i32
  }
}

</mosaic_0001>

<bundles_post_ra>
// kernel: binary_classifier_forward.1
= control target key start
LH: loop header
LB: loop body
LE: loop exit
PB: predicated region body
PF: predicated region fallthrough
CT: control target
= control target key end

     0   :  { %9 = vsyncpa [#allocation3], 0  ;;  %s1438_s0 = inlined_call_operand.vmem [shape: f32[384,32], index: 0, kind: input, shape index: {}]   ;;  %s1439_s1 = inlined_call_operand.vmem [shape: f32[384,32], index: 1, kind: input, shape index: {}]   ;;  %s1440_s2 = inlined_call_operand.vmem [shape: f32[2,2,32], index: 2, kind: input, shape index: {}]   ;;  %s1441_s3 = inlined_call_operand.vmem [shape: f32[2,1], index: 3, kind: input, shape index: {}]   ;;  %s1442_s4 = inlined_call_operand.hbm [shape: f32[2,384], index: 4, kind: output, shape index: {}]  }
   0x1   :  { %11 = vsyncpa [#allocation3 + $0x1], 0  ;;  %s1169_s15 = smov 0   ;;  %s1171_s16 = smov 0  }
   0x2   :  { %s1173_s17 = smov 0   ;;  %s1175_s18 = smov 0  }
   0x3 LB: > { %s1190_s19 = sadd.s32 4294967295, %s1140_s18   ;;  %s785_s20 = sadd.s32 4294967294, %s1140_s18   ;;  %s1140_s18 = sphi %s1175_s18, %s1450_s18   ;;  %s1136_s17 = sphi %s1173_s17, %s1449_s17   ;;  %s1132_s16 = sphi %s1171_s16, %s1448_s16   ;;  %s1128_s15 = sphi %s1169_s15, %s1447_s15  }
   0x4   : > { %s1194_s21 = sadd.s32 1, %s1140_s18   ;;  %s118_s22 = sadd.s32 1, %s1136_s17 }
   0x5   : > { %s115_s23 = ssub.s32 %s1140_s18, %s1194_s21  ;;  %p128_p0 = scmp.ne.s32.totalorder %s1136_s17, %s1132_s16 }
   0x6   : > { %p116_p1 = scmp.eq.s32.totalorder %s115_s23, 0  ;;  %p129_p2 = scmp.eq.s32.totalorder %s1190_s19, 1 }
   0x7   : > { %p134_p3 = scmp.ne.s32.totalorder %s1132_s16, %s1128_s15  ;;  %p135_p4 = scmp.eq.s32.totalorder %s785_s20, 1 }
   0x8   : > { %s1205_s24 = scalar_select %p116_p1, %s1136_s17, %s118_s22  }
   0x9   : > { %p1207_p5 = por %p129_p2, %p128_p0  ;;  %p1211_p6 = por %p135_p4, %p134_p3 }
   0xa   : > { %p788_p7 = scmp.ge.s32.totalorder %s1140_s18, 1  ;;  %p193_p8 = scmp.lt.s32.totalorder %s1140_s18, 3 }
   0xc   : > { %p194_p9 = pnand %p788_p7, %p193_p8 }
   0xd   : > { %s790_s27 = sshll.u32 (!%p194_p9), %s1190_s19, 5  ;;  %vm332_vm0 = vcmask (!%p194_p9), 261120   ;;  %v1221_v0 = vld [vmem:[%s1440_s2 + $0x2] sm:$0x3] (!%p194_p9)  ;;  %v1226_v1 = vld [vmem:[%s1440_s2] sm:$0x3] (!%p194_p9) }
   0xe   : > { %197 = sbr.rel (%p194_p9) target bundleno = 340 (0x154), region = 36  ;;  %p237_p10 = scmp.lt.s32.totalorder (!%p194_p9), %s790_s27, 47  ;;  %904 = vmatprep.mubr.msk.f32.mxu1 (!%p194_p9), %vm332_vm0, %v1221_v0  ;;  %938 = vmatprep.mubr.msk.f32.mxu0 (!%p194_p9), %vm332_vm0, %v1226_v1  ;;  %v673_v2 = vld [vmem:[%s1441_s3] sm:$0x3] (!%p194_p9)  ;;  %v1142_v3 = vmov (!%p194_p9), 0   ;;  %vm1242_vm1 = vmpackc.low (!%p194_p9), %vm332_vm0, %vm332_vm0 }
   0xf   : > { %1077 = vset.pattern.permute.xlu0 (!%p194_p9), %v1142_v3  ;;  %s229_s20 = sand.u32 (!%p194_p9), 1, %s1132_s16  }
  0x10   : > { %676 = vperm.xlu0 (!%p194_p9), %1077, %v673_v2   ;;  %s789_s22 = sshll.u32 (!%p194_p9), %s229_s20, 2 }
  0x11   : > { %s231_s23 = scalar_lea.vmem (!%p194_p9), [#allocation2], %s789_s22 }
  0x15   : > { %s1452_s27 = smov (!%p237_p10, %s790_s27), 47  ;;  %s863_s28 = sshll.u32 (%p1207_p5), %s1190_s19, 1 }
  0x16   : > { %s791_s8 = sshll.u32 %s1452_s27, 3  ;;  %s1384_s27 = scalar_lea.sflag [#allocation3], %s229_s20 }
  0x17   : > { %s1238_s11 = scalar_lea.vmem %s1439_s1, %s791_s8  ;;  %s1249_s14 = scalar_lea.vmem %s1438_s0, %s791_s8 }
  0x18   : > { %v316_v5 = vld [vmem:[%s1238_s11 + $0x80] sm:$0xff]  ;;  %v317_v6 = vld [vmem:[%s1238_s11 + $0x88] sm:$0xff]  ;;  %v318_v16 = vld [vmem:[%s1238_s11 + $0x90] sm:$0xff]  ;;  %s702_s29 = ssub.s32 (%p1207_p5), 3, %s863_s28 }
  0x19   : > { %v282_v7 = vld [vmem:[%s1249_s14 + $0x80] sm:$0xff]  ;;  %v940_v8 = vpack.c.bf16 %v317_v6, %v316_v5  ;;  %v283_v9 = vld [vmem:[%s1249_s14 + $0x88] sm:$0xff]  ;;  %v319_v18 = vld [vmem:[%s1238_s11 + $0x98] sm:$0xff]  ;;  %p703_p11 = scmp.lt.s32.totalorder (%p1207_p5), %s702_s29, 2 }
  0x1a   : > { %v300_v10 = vld [vmem:[%s1238_s11] sm:$0xff]  ;;  %v301_v11 = vld [vmem:[%s1238_s11 + $0x8] sm:$0xff]  ;;  %v988_v12 = vpack.c.bf16 %v283_v9, %v282_v7  ;;  %v284_v19 = vld [vmem:[%s1249_s14 + $0x90] sm:$0xff]  ;;  %v946_v21 = vpack.c.bf16 %v319_v18, %v318_v16 }
  0x1b   : > { %v943_v13 = vpack.c.bf16 %v301_v11, %v300_v10  ;;  %v266_v14 = vld [vmem:[%s1249_s14] sm:$0xff]  ;;  %v267_v15 = vld [vmem:[%s1249_s14 + $0x8] sm:$0xff]  ;;  %942 = vmatprep.subr.msk.bf16.mxu1 %vm1242_vm1, %v940_v8  ;;  %v285_v20 = vld [vmem:[%s1249_s14 + $0x98] sm:$0xff] }
  0x1c   : > { %v991_v17 = vpack.c.bf16 %v267_v15, %v266_v14  ;;  %990 = vmatprep.subr.msk.bf16.mxu0 %vm1242_vm1, %v988_v12  ;;  %v994_v22 = vpack.c.bf16 %v285_v20, %v284_v19  ;;  %v302_v23 = vld [vmem:[%s1238_s11 + $0x10] sm:$0xff]  ;;  %v303_v24 = vld [vmem:[%s1238_s11 + $0x18] sm:$0xff]  ;;  %v320_v27 = vld [vmem:[%s1238_s11 + $0xa0] sm:$0xff] }
  0x1d   : > { %945 = vmatpush3.bf16.xpose.msk.msra.mxu1 %vm1242_vm1, %v943_v13  ;;  %v268_v25 = vld [vmem:[%s1249_s14 + $0x10] sm:$0xff]  ;;  %v269_v26 = vld [vmem:[%s1249_s14 + $0x18] sm:$0xff]  ;;  %v321_v28 = vld [vmem:[%s1238_s11 + $0xa8] sm:$0xff]  ;;  %v949_v31 = vpack.c.bf16 %v303_v24, %v302_v23 }
  0x1e   : > { %993 = vmatpush3.bf16.xpose.msk.msra.mxu0 %vm1242_vm1, %v991_v17  ;;  %948 = vmatprep.subr.msk.bf16.mxu1 %vm1242_vm1, %v946_v21  ;;  %v286_v29 = vld [vmem:[%s1249_s14 + $0xa0] sm:$0xff]  ;;  %v287_v30 = vld [vmem:[%s1249_s14 + $0xa8] sm:$0xff]  ;;  %v997_v32 = vpack.c.bf16 %v269_v26, %v268_v25  ;;  %v952_v33 = vpack.c.bf16 %v321_v28, %v320_v27  ;;  %v322_v39 = vld [vmem:[%s1238_s11 + $0xb0] sm:$0xff] }
  0x1f   : > { %996 = vmatprep.subr.msk.bf16.mxu0 %vm1242_vm1, %v994_v22  ;;  %v1000_v34 = vpack.c.bf16 %v287_v30, %v286_v29  ;;  %v304_v35 = vld [vmem:[%s1238_s11 + $0x20] sm:$0xff]  ;;  %v305_v36 = vld [vmem:[%s1238_s11 + $0x28] sm:$0xff]  ;;  %v323_v40 = vld [vmem:[%s1238_s11 + $0xb8] sm:$0xff] }
  0x20   : > { %v270_v37 = vld [vmem:[%s1249_s14 + $0x20] sm:$0xff]  ;;  %v271_v38 = vld [vmem:[%s1249_s14 + $0x28] sm:$0xff]  ;;  %v288_v41 = vld [vmem:[%s1249_s14 + $0xb0] sm:$0xff]  ;;  %v955_v43 = vpack.c.bf16 %v305_v36, %v304_v35  ;;  %v958_v45 = vpack.c.bf16 %v323_v40, %v322_v39 }
  0x21   : > { %v289_v42 = vld [vmem:[%s1249_s14 + $0xb8] sm:$0xff]  ;;  %v1003_v44 = vpack.c.bf16 %v271_v38, %v270_v37  ;;  %v306_v47 = vld [vmem:[%s1238_s11 + $0x30] sm:$0xff]  ;;  %v324_v51 = vld [vmem:[%s1238_s11 + $0xc0] sm:$0xff] }
  0x22   : > { %v1006_v46 = vpack.c.bf16 %v289_v42, %v288_v41  ;;  %v307_v48 = vld [vmem:[%s1238_s11 + $0x38] sm:$0xff]  ;;  %v272_v49 = vld [vmem:[%s1249_s14 + $0x30] sm:$0xff]  ;;  %v325_v52 = vld [vmem:[%s1238_s11 + $0xc8] sm:$0xff] }
  0x23   : > { %v273_v50 = vld [vmem:[%s1249_s14 + $0x38] sm:$0xff]  ;;  %v290_v53 = vld [vmem:[%s1249_s14 + $0xc0] sm:$0xff]  ;;  %v291_v54 = vld [vmem:[%s1249_s14 + $0xc8] sm:$0xff]  ;;  %v961_v55 = vpack.c.bf16 %v307_v48, %v306_v47  ;;  %v964_v57 = vpack.c.bf16 %v325_v52, %v324_v51 }
  0x24   : > { %v1009_v56 = vpack.c.bf16 %v273_v50, %v272_v49  ;;  %v1012_v58 = vpack.c.bf16 %v291_v54, %v290_v53  ;;  %v308_v59 = vld [vmem:[%s1238_s11 + $0x40] sm:$0xff]  ;;  %v309_v60 = vld [vmem:[%s1238_s11 + $0x48] sm:$0xff]  ;;  %v326_v63 = vld [vmem:[%s1238_s11 + $0xd0] sm:$0xff] }
  0x25   : > { %951 = vmatpush3.bf16.xpose.msk.msra.mxu1 %vm1242_vm1, %v949_v31  ;;  %v274_v61 = vld [vmem:[%s1249_s14 + $0x40] sm:$0xff]  ;;  %v275_v62 = vld [vmem:[%s1249_s14 + $0x48] sm:$0xff]  ;;  %v327_v2 = vld [vmem:[%s1238_s11 + $0xd8] sm:$0xff]  ;;  %v967_v6 = vpack.c.bf16 %v309_v60, %v308_v59 }
  0x26   : > { %999 = vmatpush3.bf16.xpose.msk.msra.mxu0 %vm1242_vm1, %v997_v32  ;;  %954 = vmatprep.subr.msk.bf16.mxu1 %vm1242_vm1, %v952_v33  ;;  %v292_v3 = vld [vmem:[%s1249_s14 + $0xd0] sm:$0xff]  ;;  %v293_v5 = vld [vmem:[%s1249_s14 + $0xd8] sm:$0xff]  ;;  %v1015_v7 = vpack.c.bf16 %v275_v62, %v274_v61  ;;  %v970_v8 = vpack.c.bf16 %v327_v2, %v326_v63  ;;  %v328_v14 = vld [vmem:[%s1238_s11 + $0xe0] sm:$0xff] }
  0x27   : > { %1002 = vmatprep.subr.msk.bf16.mxu0 %vm1242_vm1, %v1000_v34  ;;  %v1018_v9 = vpack.c.bf16 %v293_v5, %v292_v3  ;;  %v310_v10 = vld [vmem:[%s1238_s11 + $0x50] sm:$0xff]  ;;  %v311_v11 = vld [vmem:[%s1238_s11 + $0x58] sm:$0xff]  ;;  %v329_v15 = vld [vmem:[%s1238_s11 + $0xe8] sm:$0xff] }
  0x28   : > { %v276_v12 = vld [vmem:[%s1249_s14 + $0x50] sm:$0xff]  ;;  %v277_v13 = vld [vmem:[%s1249_s14 + $0x58] sm:$0xff]  ;;  %v294_v16 = vld [vmem:[%s1249_s14 + $0xe0] sm:$0xff]  ;;  %v973_v18 = vpack.c.bf16 %v311_v11, %v310_v10  ;;  %v976_v20 = vpack.c.bf16 %v329_v15, %v328_v14 }
  0x29   : > { %v295_v17 = vld [vmem:[%s1249_s14 + $0xe8] sm:$0xff]  ;;  %v1021_v19 = vpack.c.bf16 %v277_v13, %v276_v12  ;;  %v312_v22 = vld [vmem:[%s1238_s11 + $0x60] sm:$0xff]  ;;  %v330_v26 = vld [vmem:[%s1238_s11 + $0xf0] sm:$0xff] }
  0x2a   : > { %v1024_v21 = vpack.c.bf16 %v295_v17, %v294_v16  ;;  %v313_v23 = vld [vmem:[%s1238_s11 + $0x68] sm:$0xff]  ;;  %v278_v24 = vld [vmem:[%s1249_s14 + $0x60] sm:$0xff]  ;;  %v331_v27 = vld [vmem:[%s1238_s11 + $0xf8] sm:$0xff] }
  0x2b   : > { %v279_v25 = vld [vmem:[%s1249_s14 + $0x68] sm:$0xff]  ;;  %v296_v28 = vld [vmem:[%s1249_s14 + $0xf0] sm:$0xff]  ;;  %v297_v29 = vld [vmem:[%s1249_s14 + $0xf8] sm:$0xff]  ;;  %v979_v30 = vpack.c.bf16 %v313_v23, %v312_v22  ;;  %v982_v32 = vpack.c.bf16 %v331_v27, %v330_v26 }
  0x2c   : > { %v1027_v31 = vpack.c.bf16 %v279_v25, %v278_v24  ;;  %v1030_v33 = vpack.c.bf16 %v297_v29, %v296_v28  ;;  %v314_v34 = vld [vmem:[%s1238_s11 + $0x70] sm:$0xff]  ;;  %v315_v35 = vld [vmem:[%s1238_s11 + $0x78] sm:$0xff] }
  0x2d   : > { %957 = vmatpush3.bf16.xpose.msk.msra.mxu1 %vm1242_vm1, %v955_v43  ;;  %v280_v36 = vld [vmem:[%s1249_s14 + $0x70] sm:$0xff]  ;;  %v281_v37 = vld [vmem:[%s1249_s14 + $0x78] sm:$0xff]  ;;  %v985_v38 = vpack.c.bf16 %v315_v35, %v314_v34 }
  0x2e   : > { %1005 = vmatpush3.bf16.xpose.msk.msra.mxu0 %vm1242_vm1, %v1003_v44  ;;  %960 = vmatprep.subr.msk.bf16.mxu1 %vm1242_vm1, %v958_v45  ;;  %v1033_v39 = vpack.c.bf16 %v281_v37, %v280_v36 }
  0x2f   : > { %1008 = vmatprep.subr.msk.bf16.mxu0 %vm1242_vm1, %v1006_v46 }
  0x35   : > { %963 = vmatpush3.bf16.xpose.msk.msra.mxu1 %vm1242_vm1, %v961_v55 }
  0x36   : > { %1011 = vmatpush3.bf16.xpose.msk.msra.mxu0 %vm1242_vm1, %v1009_v56  ;;  %966 = vmatprep.subr.msk.bf16.mxu1 %vm1242_vm1, %v964_v57 }
  0x37   : > { %1014 = vmatprep.subr.msk.bf16.mxu0 %vm1242_vm1, %v1012_v58 }
  0x3d   : > { %969 = vmatpush3.bf16.xpose.msk.msra.mxu1 %vm1242_vm1, %v967_v6 }
  0x3e   : > { %1017 = vmatpush3.bf16.xpose.msk.msra.mxu0 %vm1242_vm1, %v1015_v7  ;;  %972 = vmatprep.subr.msk.bf16.mxu1 %vm1242_vm1, %v970_v8 }
  0x3f   : > { %1020 = vmatprep.subr.msk.bf16.mxu0 %vm1242_vm1, %v1018_v9 }
  0x45   : > { %975 = vmatpush3.bf16.xpose.msk.msra.mxu1 %vm1242_vm1, %v973_v18 }
  0x46   : > { %1023 = vmatpush3.bf16.xpose.msk.msra.mxu0 %vm1242_vm1, %v1021_v19  ;;  %978 = vmatprep.subr.msk.bf16.mxu1 %vm1242_vm1, %v976_v20 }
  0x47   : > { %1026 = vmatprep.subr.msk.bf16.mxu0 %vm1242_vm1, %v1024_v21 }
  0x4d   : > { %981 = vmatpush3.bf16.xpose.msk.msra.mxu1 %vm1242_vm1, %v979_v30 }
  0x4e   : > { %1029 = vmatpush3.bf16.xpose.msk.msra.mxu0 %vm1242_vm1, %v1027_v31  ;;  %984 = vmatprep.subr.msk.bf16.mxu1 %vm1242_vm1, %v982_v32 }
  0x4f   : > { %1032 = vmatprep.subr.msk.bf16.mxu0 %vm1242_vm1, %v1030_v33 }
  0x55   : > { %987 = vmatpush3.bf16.xpose.msk.msra.mxu1 %vm1242_vm1, %v985_v38 }
  0x56   : > { %1035 = vmatpush3.bf16.xpose.msk.msra.mxu0 %vm1242_vm1, %v1033_v39 }
  0x5c   : > { %905 = vmatmul.mubr.msk.f32.vlgmr.msra.gmra.mrb[0].mxu1 %vm332_vm0, %v1221_v0 }
  0x5d   : > { %939 = vmatmul.mubr.msk.f32.vlgmr.msra.gmra.mrb[0].mxu0 %vm332_vm0, %v1226_v1 }
  0x8f   : > { %v677_v41 = vpop.permute.xlu0 %676 }
 0x12f   : > { %v498_v40 = vpop.f32.mrb[0].mxu1 }
 0x130   : > { %v668_v42 = vpop.f32.mrb[0].mxu0  ;;  %v500_v43 = vpop.f32.mrb[1].mxu1 }
 0x131   : > { %v669_v44 = vadd.f32 %v668_v42, %v498_v40  ;;  %v670_v45 = vpop.f32.mrb[1].mxu0 }
 0x132   : > { %v671_v46 = vadd.f32 %v670_v45, %v500_v43  ;;  %700 = sbr.rel (!%p1207_p5) target bundleno = 340 (0x154), region = 40 }
 0x133   : > { %v679_v47 = vadd.f32 %v677_v41, %v669_v44 }
 0x134   : > { %v680_v48 = vadd.f32 %v677_v41, %v671_v46 }
 0x136   : > { %v683_v49 = vcombine.low %v679_v47, %v680_v48 }
 0x138   : > { %861 = vst.sshfl [vmem:[%s231_s23] sm:$0x33 pattern:$0x76325410] %v683_v49 }
 0x139   : > { %s1454_s29 = smov (!%p703_p11, %s702_s29), 2 }
 0x13a   : > { %s1389_s30 = sshll.u32 %s1454_s29, 5 }
 0x13b   : > { %s707_s5 = ssub.s32 64, %s1389_s30 }
 0x13c   : > { %708 = vsyncadd %s1384_s27, %s707_s5  ;;  %p865_p12 = scmp.ne.s32.totalorder %s1389_s30, 0  ;;  %s871_s6 = sshll.u32 %s1190_s19, 6 }
 0x13d   : > { %s1398_s8 = scalar_lea.hbm %s1442_s4, %s871_s6  ;;  %s714_s9 = sshll.u32 %s231_s23, 4  ;;  %s715_s9 = int_to_ptr.vmem [resolvable:$true] %s714_s9 }
 0x13e   : > { %s1078_s10 = scalar_lea.vmem %s715_s9, %s1389_s30  ;;  %s1143_s11 = smov [#allocation2]  }
 0x13f   : > { %p1079_p13 = scmp.ne.s32.totalorder %s715_s9, %s1078_s10  ;;  %s1082_s12 = sshll.u32 %s1143_s11, 4  ;;  %s1083_s12 = int_to_ptr.vmem [resolvable:$false] %s1082_s12 }
 0x140   : > { %s1084_s13 = scalar_lea.vmem %s1083_s12, 128  ;;  %p1085_p2 = scmp.lt.s32.totalorder %s715_s9, %s1083_s12 }
 0x141   : > { %p1080_p0 = pnand %p1079_p13, %p865_p12  ;;  %p1086_p3 = scmp.lt.s32.totalorder %s1084_s13, %s1078_s10 }
 0x143   : > { %p1081_p1 = pneg %p1080_p0  ;;  %p1087_p4 = por %p1086_p3, %p1085_p2 }
 0x145   : > { %p1088_p5 = pnand %p1087_p4, %p1081_p1 }
 0x147   : > { %1091 = shalt.err (!%p1088_p5)
}
 0x148   : > { %s1092_s19 = scalar_lea.hbm %s1398_s8, %s1389_s30  ;;  %s1096_s22 = scalar_lea.hbm %s1442_s4, 96 }
 0x149   : > { %p1093_p7 = scmp.ne.s32.totalorder %s1398_s8, %s1092_s19  ;;  %p1097_p10 = scmp.lt.u32.totalorder %s1398_s8, %s1442_s4 }
 0x14a   : > { %p1098_p11 = scmp.lt.u32.totalorder %s1096_s22, %s1092_s19  ;;  %p1100_p0 = scmp.lt.u32.totalorder %s1092_s19, %s1398_s8 }
 0x14b   : > { %p1094_p8 = pnand %p1093_p7, %p865_p12 }
 0x14c   : > { %p1099_p13 = por %p1098_p11, %p1097_p10 }
 0x14d   : > { %p1095_p9 = pneg %p1094_p8 }
 0x14e   : > { %p1101_p1 = por %p1100_p0, %p1099_p13 }
 0x150   : > { %p1102_p2 = pnand %p1101_p1, %p1095_p9 }
 0x152   : > { %1105 = shalt.err (!%p1102_p2)
}
 0x153   : > { %717 = dma.vmem_to_hbm [thread:$0]  (%p865_p12), %s715_s9, %s1389_s30, %s1398_s8, %s1384_s27  }
 0x154 PF: > { %p1043_p3 = scmp.ge.s32.totalorder %s1140_s18, 2  ;;  %s726_s29 = sand.u32 1, %s1128_s15  }
 0x155   : > { %s727_s5 = scalar_lea.sflag [#allocation3], %s726_s29 }
 0x156   : > { %p1040_p4 = pnand %p1043_p3, %p1211_p6 }
 0x158   : > { %1123 = dma.done.wait (!%p1040_p4), %s727_s5, 64  }
 0x159   : > { %1125 = vsyncadd (!%p1040_p4), %s727_s5, 4294967232  ;;  %p14_p5 = scmp.ge.s32.totalorder %s1194_s21, 4   ;;  %s1447_s15 = smov %s1132_s16 }
 0x15a   : > { %s1448_s16 = smov %s1136_s17  ;;  %s1449_s17 = smov %s1205_s24 }
 0x15b   : > { %s1450_s18 = smov %s1194_s21  ;;  %16 = sbr.rel (!%p14_p5) target bundleno = 3 (0x3), region = 75 }
 0x162   :  { %732 = vsyncpa [#allocation3], 1 }
 0x163   :  { %734 = vsyncpa [#allocation3 + $0x1], 1 }

</bundles_post_ra>
